<compile_context>
chip_gen: v7x
topology: tpu7x:2x2x1
jax: 0.10.0
libtpu: 0.0.40
codegen_flags: <defaults>
</compile_context>

<pallas_src>
import functools

import jax
import jax.numpy as jnp
from jax import lax
from jax.experimental import pallas as pl
from jax.experimental.pallas import tpu as pltpu

_LANE = 128
_SUBLANE = 8


# --------------------------------------------------------------------------
# Chip-dependent tuning
# --------------------------------------------------------------------------
def _chip_config():
    kind = ""
    try:
        kind = jax.devices()[0].device_kind.lower()
    except Exception:
        pass
    if "v7" in kind or "7x" in kind:
        # 64 MiB physical VMEM, ~3.2 TB/s HBM, 2 TensorCores per chip.
        return dict(fused_max_bytes=8 << 20, fused_vmem=40 << 20,
                    tile_rows=8192, tiled_vmem=48 << 20,
                    ncores=2, native_reduce=True)
    if "v6" in kind:
        # 128 MiB physical VMEM, ~1.4 TB/s HBM, bf16 VPU.
        return dict(fused_max_bytes=20 << 20, fused_vmem=64 << 20,
                    tile_rows=4096, tiled_vmem=32 << 20,
                    ncores=1, native_reduce=True)
    if "v5" in kind or "v4" in kind:
        # 128 MiB physical VMEM (16 MiB scoped default), no bf16 VPU.
        return dict(fused_max_bytes=10 << 20, fused_vmem=48 << 20,
                    tile_rows=4096, tiled_vmem=32 << 20,
                    ncores=1, native_reduce=False)
    # Unknown chip: conservative defaults, do not touch VMEM limits.
    return dict(fused_max_bytes=4 << 20, fused_vmem=None,
                tile_rows=2048, tiled_vmem=None,
                ncores=1, native_reduce=False)


# --------------------------------------------------------------------------
# Kernels
# --------------------------------------------------------------------------
def _valid_mask(shape, row_offset, full_rows, tail_len):
    """Validity mask for a (block_rows, 128) block starting at global row
    `row_offset`.  Rows < full_rows are fully valid; row == full_rows is the
    ragged row (lane < tail_len valid); anything past it is padding."""
    row = row_offset + lax.broadcasted_iota(jnp.int32, shape, 0)
    lane = lax.broadcasted_iota(jnp.int32, shape, 1)
    return jnp.logical_or(row < full_rows,
                          jnp.logical_and(row == full_rows, lane < tail_len))


def _fused_kernel(x_ref, o_ref, *, full_rows, tail_len, out_range, eps):
    """Whole-array-in-VMEM path: global min/max + rescale in one call."""
    xf = x_ref[...].astype(jnp.float32)
    if tail_len:
        valid = _valid_mask(xf.shape, 0, full_rows, tail_len)
        mn = jnp.min(jnp.where(valid, xf, jnp.inf))
        mx = jnp.max(jnp.where(valid, xf, -jnp.inf))
    else:
        mn = jnp.min(xf)
        mx = jnp.max(xf)
    scale = out_range / ((mx - mn) + eps)
    o_ref[...] = ((xf - mn) * scale).astype(o_ref.dtype)


def _minmax_kernel(x_ref, min_ref, max_ref, accmin_ref, accmax_ref, *,
                   rows, full_rows, tail_len, tile_rows, num_tiles,
                   reduce_dtype):
    """Pass 1: global min/max.  grid = (ncores, tiles_per_core); the leading
    axis may be sharded across TensorCores ("parallel")."""
    c = pl.program_id(0)
    t = pl.program_id(1)
    tiles_per_core = pl.num_programs(1)
    g = c * tiles_per_core + t                      # global tile index
    block_rows = x_ref.shape[0]
    x = x_ref[...].astype(reduce_dtype)             # no-op when dtypes match

    if block_rows % _SUBLANE != 0:
        # Single full-array block (< 8 rows / non-multiple-of-8): grid is
        # (1, 1); reduce directly (masking the padded tail if present).
        if tail_len:
            valid = _valid_mask(x.shape, 0, full_rows, tail_len)
            mn = jnp.min(jnp.where(valid, x, jnp.array(jnp.inf, reduce_dtype)))
            mx = jnp.max(jnp.where(valid, x, jnp.array(-jnp.inf, reduce_dtype)))
        else:
            mn = jnp.min(x)
            mx = jnp.max(x)
        min_ref[...] = mn.astype(jnp.float32).reshape(1, 1)
        max_ref[...] = mx.astype(jnp.float32).reshape(1, 1)
        return

    @pl.when(t == 0)                                # per-core accumulator init
    def _():
        accmin_ref[...] = jnp.full((_SUBLANE, _LANE), jnp.inf, jnp.float32)
        accmax_ref[...] = jnp.full((_SUBLANE, _LANE), -jnp.inf, jnp.float32)

    def fold(x_for_min, x_for_max):
        # Fold the tile into a vreg-sized (8,128) partial (pure VPU work);
        # the expensive cross-lane reduce happens once per core at the end.
        tmin = jnp.min(x_for_min.reshape(-1, _SUBLANE, _LANE), axis=0)
        tmax = jnp.max(x_for_max.reshape(-1, _SUBLANE, _LANE), axis=0)
        accmin_ref[...] = jnp.minimum(accmin_ref[...], tmin.astype(jnp.float32))
        accmax_ref[...] = jnp.maximum(accmax_ref[...], tmax.astype(jnp.float32))

    # Mask (iota + compare + select) only on the last tile; interior tiles do
    # the plain fold.  (Duplicate steps from an uneven 2-core split re-read
    # tile 0 unmasked; duplicated data is a no-op for min/max.)
    mask_last = (tail_len > 0) or (rows % tile_rows != 0)
    if mask_last:
        is_last_tile = g == num_tiles - 1

        @pl.when(jnp.logical_not(is_last_tile))
        def _():
            fold(x, x)

        @pl.when(is_last_tile)
        def _():
            valid = _valid_mask(x.shape, g * tile_rows, full_rows, tail_len)
            fold(jnp.where(valid, x, jnp.array(jnp.inf, reduce_dtype)),
                 jnp.where(valid, x, jnp.array(-jnp.inf, reduce_dtype)))
    else:
        fold(x, x)

    @pl.when(t == tiles_per_core - 1)               # per-core partial result
    def _():
        min_ref[...] = jnp.min(accmin_ref[...]).reshape(1, 1)
        max_ref[...] = jnp.max(accmax_ref[...]).reshape(1, 1)


def _scale_kernel(x_ref, min_ref, scale_ref, o_ref):
    """Pass 2: y = (x - min) * scale, with min/scale as (1,1) SMEM scalars."""
    mn = min_ref[0, 0]
    sc = scale_ref[0, 0]
    o_ref[...] = ((x_ref[...].astype(jnp.float32) - mn) * sc).astype(o_ref.dtype)


# --------------------------------------------------------------------------
# Wrapper
# --------------------------------------------------------------------------
def scale_dynamic_range(x, scaler_bounds=(0.0, 1.0), epsilon=1e-9, *,
                        _force_two_pass=False, _tile_rows=None):
    """Pallas implementation of ScaleDynamicRange.forward (global min-max scale)."""
    out_range = float(scaler_bounds[1] - scaler_bounds[0])
    eps = float(epsilon)
    orig_shape = x.shape
    orig_dtype = jnp.dtype(x.dtype)
    total = x.size

    # Match torch's promotion: float stays, everything else -> float32.
    out_dtype = orig_dtype if jnp.issubdtype(orig_dtype, jnp.floating) \
        else jnp.dtype(jnp.float32)
    if total == 0:
        return x.astype(out_dtype)

    cfg = _chip_config()

    # min/max are exact in any float dtype; reduce bf16/f16 natively where the
    # VPU supports it (v6e/v7x), otherwise cast to f32 in-register.
    if orig_dtype == jnp.dtype(jnp.float32):
        reduce_dtype = jnp.float32
    elif cfg["native_reduce"] and orig_dtype in (jnp.dtype(jnp.bfloat16),
                                                 jnp.dtype(jnp.float16)):
        reduce_dtype = orig_dtype
    else:
        reduce_dtype = jnp.float32

    # Flatten to a lane-dense (rows, 128) slab.  total % 128 == 0 -> pure
    # bitcast reshape (no HBM copy).  Otherwise pad the <=127-element tail
    # (full-array copy; see module TODO) and mask it inside the kernels.
    full_rows, tail_len = divmod(total, _LANE)
    flat = x.reshape(-1)
    if tail_len:
        flat = jnp.concatenate(
            [flat, jnp.zeros((_LANE - tail_len,), flat.dtype)])
    x2 = flat.reshape(-1, _LANE)
    rows = x2.shape[0]                      # full_rows + (1 if tail_len else 0)

    in_bytes = rows * _LANE * orig_dtype.itemsize
    out_bytes = rows * _LANE * jnp.dtype(out_dtype).itemsize
    # Alias the output onto the slab only when the slab is a private padded
    # copy (never the caller's buffer) and dtypes match.
    alias = bool(tail_len) and (orig_dtype == jnp.dtype(out_dtype))

    def _finish(y2):
        if tail_len:
            return y2.reshape(-1)[:total].reshape(orig_shape)
        return y2.reshape(orig_shape)       # bitcast, no copy

    # ---- fused single-call path (1R + 1W of HBM) ----------------------------
    if (not _force_two_pass) and (in_bytes + out_bytes <= cfg["fused_max_bytes"]):
        fused_kwargs = {}
        if cfg["fused_vmem"]:
            fused_kwargs["compiler_params"] = pltpu.CompilerParams(
                vmem_limit_bytes=cfg["fused_vmem"])
        y2 = pl.pallas_call(
            functools.partial(_fused_kernel, full_rows=full_rows,
                              tail_len=tail_len, out_range=out_range, eps=eps),
            out_shape=jax.ShapeDtypeStruct(x2.shape, out_dtype),
            input_output_aliases=({0: 0} if alias else {}),
            **fused_kwargs,
        )(x2)
        return _finish(y2)

    # ---- two-pass tiled path -------------------------------------------------
    req = cfg["tile_rows"] if _tile_rows is None else int(_tile_rows)
    req = max(_SUBLANE, (req // _SUBLANE) * _SUBLANE)   # multiple of 8
    tile_rows = rows if rows <= req else req            # full dim or mult-of-8
    num_tiles = pl.cdiv(rows, tile_rows)
    ncores = cfg["ncores"] if num_tiles >= 4 else 1     # v7x 2-TC split
    tiles_per_core = pl.cdiv(num_tiles, ncores)

    if ncores == 1:
        x_map = lambda c, t: (t, 0)
    else:
        def x_map(c, t):
            g = c * tiles_per_core + t
            # Out-of-range steps (odd tile count) re-read tile 0; duplicated
            # data is a no-op for min/max (and tile 0 is never the ragged one).
            return (jnp.where(g < num_tiles, g, 0), 0)

    p1_params = dict(dimension_semantics=("parallel", "arbitrary"))
    p2_params = dict(dimension_semantics=("parallel",))
    if cfg["tiled_vmem"]:
        p1_params["vmem_limit_bytes"] = cfg["tiled_vmem"]
        p2_params["vmem_limit_bytes"] = cfg["tiled_vmem"]

    # Pass 1: global min / max (per-core sequential reduce, VMEM accumulator).
    mins, maxs = pl.pallas_call(
        functools.partial(_minmax_kernel, rows=rows, full_rows=full_rows,
                          tail_len=tail_len, tile_rows=tile_rows,
                          num_tiles=num_tiles, reduce_dtype=reduce_dtype),
        out_shape=(jax.ShapeDtypeStruct((ncores, 1), jnp.float32),
                   jax.ShapeDtypeStruct((ncores, 1), jnp.float32)),
        grid=(ncores, tiles_per_core),
        in_specs=[pl.BlockSpec((tile_rows, _LANE), x_map)],
        out_specs=(pl.BlockSpec((1, 1), lambda c, t: (c, 0)),
                   pl.BlockSpec((1, 1), lambda c, t: (c, 0))),
        scratch_shapes=[pltpu.VMEM((_SUBLANE, _LANE), jnp.float32),
                        pltpu.VMEM((_SUBLANE, _LANE), jnp.float32)],
        compiler_params=pltpu.CompilerParams(**p1_params),
    )(x2)

    # Combine the per-core partials + compute the scale (tiny XLA ops).
    mn = jnp.min(mins)
    mx = jnp.max(maxs)
    scale = (out_range / ((mx - mn) + eps)).astype(jnp.float32)

    # Pass 2: elementwise rescale (parallel grid), scalars live in SMEM.
    y2 = pl.pallas_call(
        _scale_kernel,
        out_shape=jax.ShapeDtypeStruct(x2.shape, out_dtype),
        grid=(num_tiles,),
        in_specs=[pl.BlockSpec((tile_rows, _LANE), lambda i: (i, 0)),
                  pl.BlockSpec(memory_space=pltpu.SMEM),
                  pl.BlockSpec(memory_space=pltpu.SMEM)],
        out_specs=pl.BlockSpec((tile_rows, _LANE), lambda i: (i, 0)),
        input_output_aliases=({0: 0} if alias else {}),
        compiler_params=pltpu.CompilerParams(**p2_params),
    )(x2, mn.reshape(1, 1), scale.reshape(1, 1))

    return _finish(y2)


# --------------------------------------------------------------------------
# Demo / self-check
# --------------------------------------------------------------------------
def _ref(x, bounds=(0.0, 1.0), eps=1e-9):
    """Pure-JAX reference of the exact PyTorch forward semantics."""
    rng = bounds[1] - bounds[0]
    x_min_sub = x - jnp.min(x)
    return x_min_sub * (rng / (jnp.max(x_min_sub) + eps))


if __name__ == "__main__":
    key = jax.random.PRNGKey(0)
    # NCHW input, like the PyTorch module would see from a DataLoader.
    x = jax.random.normal(key, (2, 4, 16, 16), dtype=jnp.float32) * 3.0 + 1.5

    # 1) default (fused single-call) path, 128-aligned total (zero-copy slab)
    y = jax.block_until_ready(scale_dynamic_range(x))
    assert y.shape == x.shape and y.dtype == x.dtype
    assert jnp.allclose(y, _ref(x), atol=1e-5, rtol=1e-5)

    # 2) tiled two-pass path (multi-tile (8,128) accumulator reduce)
    y2 = jax.block_until_ready(
        scale_dynamic_range(x, _force_two_pass=True, _tile_rows=8))
    assert jnp.allclose(y2, _ref(x), atol=1e-5, rtol=1e-5)

    # 3) ragged total, fused path: tail masking + output aliasing + unpad
    x3 = jax.random.normal(jax.random.PRNGKey(0), (3, 5, 7, 11), jnp.float32)
    y3 = jax.block_until_ready(scale_dynamic_range(x3))
    assert y3.shape == x3.shape
    assert jnp.allclose(y3, _ref(x3), atol=1e-5, rtol=1e-5)

    # 4) ragged total, two-pass with a masked partial LAST tile only
    y4 = jax.block_until_ready(
        scale_dynamic_range(x3, _force_two_pass=True, _tile_rows=8))
    assert jnp.allclose(y4, _ref(x3), atol=1e-5, rtol=1e-5)

    # 5) ragged total, two-pass, single full-array (<8-row) block path
    y5 = jax.block_until_ready(scale_dynamic_range(x3, _force_two_pass=True))
    assert jnp.allclose(y5, _ref(x3), atol=1e-5, rtol=1e-5)

    # 6) custom scaler bounds
    y6 = jax.block_until_ready(scale_dynamic_range(x, scaler_bounds=(-1.0, 3.0)))
    assert jnp.allclose(y6, _ref(x, (-1.0, 3.0)), atol=1e-5, rtol=1e-5)

    print("KERNEL_OK")
</pallas_src>

<mosaic_0001>
module attributes {stable_mosaic.version = 11 : i64} {
  func.func @_fused_kernel(%arg0: memref<16x128xf32, #tpu.memory_space<vmem>>, %arg1: memref<16x128xf32, #tpu.memory_space<vmem>>) attributes {dimension_semantics = [], scalar_prefetch = 0 : i64, scratch_operands = 0 : i64, tpu.core_type = #tpu.core_type<tc>} {
    %c0 = arith.constant 0 : index
    %c0_0 = arith.constant 0 : index
    %0 = vector.load %arg0[%c0, %c0_0] : memref<16x128xf32, #tpu.memory_space<vmem>>, vector<16x128xf32>
    %1 = vector.shape_cast %0 : vector<16x128xf32> to vector<1x16x128xf32>
    %cst = arith.constant dense<0x7F800000> : vector<1xf32>
    %2 = vector.multi_reduction <minimumf>, %1, %cst [1, 2] : vector<1x16x128xf32> to vector<1xf32>
    %3 = vector.shape_cast %2 : vector<1xf32> to vector<1x1x1xf32>
    %4 = vector.extract %3[0, 0, 0] : f32 from vector<1x1x1xf32>
    %5 = vector.shape_cast %0 : vector<16x128xf32> to vector<1x16x128xf32>
    %cst_1 = arith.constant dense<0xFF800000> : vector<1xf32>
    %6 = vector.multi_reduction <maximumf>, %5, %cst_1 [1, 2] : vector<1x16x128xf32> to vector<1xf32>
    %7 = vector.shape_cast %6 : vector<1xf32> to vector<1x1x1xf32>
    %8 = vector.extract %7[0, 0, 0] : f32 from vector<1x1x1xf32>
    %9 = arith.subf %8, %4 : f32
    %cst_2 = arith.constant 9.99999971E-10 : f32
    %10 = arith.addf %9, %cst_2 : f32
    %cst_3 = arith.constant 1.000000e+00 : f32
    %11 = arith.divf %cst_3, %10 : f32
    %12 = vector.broadcast %4 : f32 to vector<16x128xf32>
    %13 = arith.subf %0, %12 : vector<16x128xf32>
    %14 = vector.broadcast %11 : f32 to vector<16x128xf32>
    %15 = arith.mulf %13, %14 : vector<16x128xf32>
    %c0_4 = arith.constant 0 : index
    %c0_5 = arith.constant 0 : index
    %16 = vector.load %arg1[%c0_4, %c0_5] : memref<16x128xf32, #tpu.memory_space<vmem>>, vector<16x128xf32>
    tpu.vector_store %arg1[%c0_4, %c0_5], %15 {strides = array<i32>} : memref<16x128xf32, #tpu.memory_space<vmem>>, vector<16x128xf32>,
    return
  }
}

</mosaic_0001>

<bundles_post_ra>
// kernel: tpu_custom_call.1
= control target key start
LH: loop header
LB: loop body
LE: loop exit
PB: predicated region body
PF: predicated region fallthrough
CT: control target
= control target key end

     0   :  { %6 = vsyncpa [#allocation3], 0  ;;  %s179_s0 = inlined_call_operand.hbm [shape: f32[16,128], index: 0, kind: input, shape index: {}]   ;;  %s180_s1 = inlined_call_operand.hbm [shape: f32[16,128], index: 1, kind: output, shape index: {}]  }
   0x1   :  { %7 = vsyncpa [#allocation4], 0  ;;  %s135_s6 = smov [#allocation2]   ;;  %s87_s10 = scalar_lea.hbm %s179_s0, 256 }
   0x2   :  { %s13_s7 = sshll.u32 %s135_s6, 4  ;;  %p88_p0 = scmp.ne.s32.totalorder %s179_s0, %s87_s10  ;;  %s14_s7 = int_to_ptr.vmem [resolvable:$true] %s13_s7 }
   0x3   :  { %p91_p1 = scmp.lt.u32.totalorder %s87_s10, %s179_s0 }
   0x5   :  { %p93_p2 = pnand %p91_p1, %p88_p0 }
   0x7   :  { %96 = shalt.err (!%p93_p2)
}
   0x8   :  { %s97_s15 = scalar_lea.vmem %s14_s7, 256  ;;  %p102_p4 = scmp.lt.s32.totalorder %s14_s7, %s14_s7 }
   0x9   :  { %p98_p3 = scmp.ne.s32.totalorder %s14_s7, %s97_s15  ;;  %p103_p5 = scmp.lt.s32.totalorder %s97_s15, %s97_s15 }
   0xb   :  { %p104_p6 = por %p103_p5, %p102_p4 }
   0xd   :  { %p105_p7 = pnand %p104_p6, %p98_p3 }
   0xf   :  { %108 = shalt.err (!%p105_p7)
}
  0x10   :  { %s136_s16 = smov 128   ;;  %s137_s17 = smov 8  }
  0x11   :  { %19 = dma.hbm_to_vmem [thread:$0]  %s179_s0, 256, %s14_s7, [#allocation3], %s136_s16, %s136_s16, %s137_s17  }
  0x12   :  { %131 = dma.done.wait [#allocation3], 256  }
  0x13   :  { %132 = vsyncadd [#allocation3], 4294967040  ;;  %v23_v0 = vld [vmem:[#allocation2] sm:$0xff]  ;;  %v24_v1 = vld [vmem:[#allocation2 + $0x8] sm:$0xff]  ;;  %s138_s23 = smov [#allocation5]  }
  0x14   :  { %v25_v2 = vmin.f32 %v23_v0, %v24_v1  ;;  %v35_v3 = vmax.f32 %v23_v0, %v24_v1  ;;  %s63_s24 = sshll.u32 %s138_s23, 4  ;;  %s64_s24 = int_to_ptr.vmem [resolvable:$true] %s63_s24 }
  0x15   :  { %s109_s26 = scalar_lea.vmem %s64_s24, 256  ;;  %p114_p9 = scmp.lt.s32.totalorder %s64_s24, %s64_s24 }
  0x16   :  { %26 = vmin.xlane.f32.xlu0 %v25_v2  ;;  %p110_p8 = scmp.ne.s32.totalorder %s64_s24, %s109_s26  ;;  %p115_p10 = scmp.lt.s32.totalorder %s109_s26, %s109_s26 }
  0x18   :  { %p116_p11 = por %p115_p10, %p114_p9 }
  0x1a   :  { %36 = vmax.xlane.f32.xlu0 %v35_v3  ;;  %p117_p12 = pnand %p116_p11, %p110_p8 }
  0xa3   :  { %v27_v4 = vpop.xlane.xlu0 %26 }
  0xa4   :  { %v28_v5 = vrot.slane %v27_v4, 4 }
  0xa6   :  { %v29_v6 = vmin.f32 %v27_v4, %v28_v5 }
  0xa7   :  { %v37_v7 = vpop.xlane.xlu0 %36 }
  0xa8   :  { %v30_v8 = vrot.slane %v29_v6, 2  ;;  %v38_v9 = vrot.slane %v37_v7, 4 }
  0xaa   :  { %v39_v10 = vmax.f32 %v37_v7, %v38_v9  ;;  %v31_v11 = vmin.f32 %v29_v6, %v30_v8 }
  0xac   :  { %v40_v12 = vrot.slane %v39_v10, 2  ;;  %v32_v13 = vrot.slane %v31_v11, 1 }
  0xae   :  { %v41_v14 = vmax.f32 %v39_v10, %v40_v12  ;;  %v33_v15 = vmin.f32 %v31_v11, %v32_v13 }
  0xb0   :  { %75 = vpush %v33_v15  ;;  %v42_v16 = vrot.slane %v41_v14, 1 }
  0xb2   :  { %v43_v17 = vmax.f32 %v41_v14, %v42_v16 }
  0xb4   :  { %77 = vpush %v43_v17 }
  0xe1   :  { %s76_s0 = spop %75 }
  0xe2   :  { %v50_v20 = vstv %s76_s0 }
  0xe3   :  { %v51_v21 = vsub.f32 %v23_v0, %v50_v20  ;;  %v52_v22 = vsub.f32 %v24_v1, %v50_v20 }
  0xe5   :  { %s78_s20 = spop %77 }
  0xe6   :  { %s45_s21 = ssub.f32 %s78_s20, %s76_s0 }
  0xe8   :  { %s46_s22 = sadd.f32 1e-09, %s45_s21 }
  0xea   :  { %v47_v18 = vstv %s46_s22 }
  0xeb   :  { %85 = vrcp.f32 %v47_v18 }
  0xf5   :  { %v86_v19 = vpop.eup %85 }
  0xf6   :  { %79 = vpush %v86_v19 }
 0x127   :  { %s80_s25 = spop %79 }
 0x128   :  { %v53_v23 = vstv %s80_s25 }
 0x129   :  { %v54_v24 = vmul.f32 %v53_v23, %v51_v21  ;;  %v55_v25 = vmul.f32 %v53_v23, %v52_v22 }
 0x12b   :  { %56 = vst [vmem:[#allocation5] sm:$0xff] %v54_v24  ;;  %57 = vst [vmem:[#allocation5 + $0x8] sm:$0xff] %v55_v25 }
 0x12c   :  { %120 = shalt.err (!%p117_p12)
}
 0x12d   :  { %s121_s29 = scalar_lea.hbm %s180_s1, 256 }
 0x12e   :  { %p122_p13 = scmp.ne.s32.totalorder %s180_s1, %s121_s29  ;;  %p125_p0 = scmp.lt.u32.totalorder %s121_s29, %s180_s1 }
 0x130   :  { %p127_p1 = pnand %p125_p0, %p122_p13 }
 0x132   :  { %130 = shalt.err (!%p127_p1)
}
 0x133   :  { %69 = dma.vmem_to_hbm [thread:$0]  %s64_s24, 256, %s180_s1, [#allocation4], %s136_s16, %s136_s16, %s137_s17  }
 0x134   :  { %133 = dma.done.wait [#allocation4], 256  }
 0x135   :  { %134 = vsyncadd [#allocation4], 4294967040 }
 0x136   :  { %73 = vsyncpa [#allocation3], 1 }
 0x137   :  { %74 = vsyncpa [#allocation4], 1 }

</bundles_post_ra>
